<compile_context>
chip_gen: v7x
topology: tpu7x:2x2x1
jax: 0.10.0
libtpu: 0.0.40
codegen_flags: <defaults>
</compile_context>

<pallas_src>
import functools

import jax
import jax.numpy as jnp
from jax import lax
from jax.experimental import pallas as pl
from jax.experimental.pallas import tpu as pltpu

LANE = 128
MAX_BLOCK_ROWS_EW = 1024    # elementwise path: 3-4 streams incl. writeback
MAX_BLOCK_ROWS_RED = 2048   # reduction path: 2-3 read-only streams


def _round_up(a, b):
    return (a + b - 1) // b * b


def _cdiv(a, b):
    return -(-a // b)


def _smooth_l1(x, t):
    d = x.astype(jnp.float32) - t.astype(jnp.float32)
    ad = jnp.abs(d)
    return jnp.where(ad < 1.0, 0.5 * d * d, ad - 0.5)


# ---------------- kernels ----------------

def _ew_kernel(x_ref, t_ref, o_ref):
    o_ref[...] = _smooth_l1(x_ref[...], t_ref[...]).astype(o_ref.dtype)


def _ew_w_kernel(x_ref, t_ref, w_ref, o_ref):
    loss = _smooth_l1(x_ref[...], t_ref[...]) * w_ref[...].astype(jnp.float32)
    o_ref[...] = loss.astype(o_ref.dtype)


def _row_limit(block_rows, valid_rows_last):
    """Valid-row count of the current block (== block_rows except last step)."""
    last = pl.program_id(0) == pl.num_programs(0) - 1
    return jnp.where(last, valid_rows_last, block_rows)


def _reduce_loss_kernel(x_ref, t_ref, o_ref, acc_ref, *, block_rows,
                        valid_rows_last):
    """Partial sum of smooth_l1(x, t) into an (8,128) f32 VMEM accumulator."""
    s = pl.program_id(0)

    @pl.when(s == 0)
    def _():
        acc_ref[...] = jnp.zeros_like(acc_ref)

    loss = _smooth_l1(x_ref[...], t_ref[...])
    if valid_rows_last < block_rows:       # static: final grid block is partial
        row = lax.broadcasted_iota(jnp.int32, (block_rows, LANE), 0)
        loss = jnp.where(row < _row_limit(block_rows, valid_rows_last), loss, 0.0)
    acc_ref[...] += loss.reshape(-1, 8, LANE).sum(axis=0)

    @pl.when(s == pl.num_programs(0) - 1)
    def _():
        o_ref[...] = jnp.sum(acc_ref[...]).reshape(1, 1)


def _reduce_loss_w_kernel(x_ref, t_ref, w_ref, lo_ref, wo_ref,
                          lacc_ref, wacc_ref, *, block_rows, valid_rows_last):
    """Partial sums of smooth_l1(x, t) and of w."""
    s = pl.program_id(0)

    @pl.when(s == 0)
    def _():
        lacc_ref[...] = jnp.zeros_like(lacc_ref)
        wacc_ref[...] = jnp.zeros_like(wacc_ref)

    loss = _smooth_l1(x_ref[...], t_ref[...])
    w = w_ref[...].astype(jnp.float32)
    if valid_rows_last < block_rows:       # static: final grid block is partial
        row = lax.broadcasted_iota(jnp.int32, (block_rows, LANE), 0)
        keep = row < _row_limit(block_rows, valid_rows_last)
        loss = jnp.where(keep, loss, 0.0)
        w = jnp.where(keep, w, 0.0)
    lacc_ref[...] += loss.reshape(-1, 8, LANE).sum(axis=0)
    wacc_ref[...] += w.reshape(-1, 8, LANE).sum(axis=0)

    @pl.when(s == pl.num_programs(0) - 1)
    def _():
        lo_ref[...] = jnp.sum(lacc_ref[...]).reshape(1, 1)
        wo_ref[...] = jnp.sum(wacc_ref[...]).reshape(1, 1)


# ---------------- wrapper helpers ----------------

def _vmem_budget(n_streams, block_rows, itemsize=4):
    """Double-buffered streams + scratch/outputs + margin; capped well under
    every generation's physical VMEM (v7x has only 64 MiB per TC)."""
    blk = block_rows * LANE * itemsize
    return int(min(32 * 1024 * 1024, n_streams * 2 * blk + (4 << 20)))


def _cost(n_elems, in_arrays, out_itemsize):
    in_bytes = sum(int(a.dtype.itemsize) for a in in_arrays) * n_elems
    return pl.CostEstimate(flops=7 * n_elems, transcendentals=0,
                           bytes_accessed=int(in_bytes + out_itemsize * n_elems))


# ---------------- public entry point ----------------

def weighted_smooth_l1_loss(inp, target, weight=None, reduction="mean"):
    assert inp.shape == target.shape
    if weight is not None:
        assert weight.shape == inp.shape

    orig_shape = inp.shape
    n = int(inp.size)
    rows8 = _round_up(max(_cdiv(n, LANE), 1), 8)
    pad = rows8 * LANE - n        # only a ragged tail; 0 for n % 1024 == 0

    def slab(a):
        # Flatten; zero-pad ONLY the ragged tail (zeros give zero loss / zero
        # weight so they never affect results); no dtype cast (kernel upcasts).
        flat = jnp.ravel(a)
        if pad:
            flat = jnp.pad(flat, (0, pad))
        return flat.reshape(rows8, LANE)

    # ----- reduction == 'none': elementwise kernel -----
    if reduction == "none":
        block_rows = min(MAX_BLOCK_ROWS_EW, rows8)
        grid_steps = _cdiv(rows8, block_rows)
        tile = pl.BlockSpec((block_rows, LANE), lambda i: (i, 0))

        x2, t2 = slab(inp), slab(target)
        if weight is None:
            out_dtype = jnp.result_type(inp.dtype, target.dtype)
            kernel, ins = _ew_kernel, (x2, t2)
        else:
            out_dtype = jnp.result_type(inp.dtype, target.dtype, weight.dtype)
            kernel, ins = _ew_w_kernel, (x2, t2, slab(weight))

        out = pl.pallas_call(
            kernel,
            out_shape=jax.ShapeDtypeStruct((rows8, LANE), out_dtype),
            grid_spec=pltpu.PrefetchScalarGridSpec(
                num_scalar_prefetch=0,
                grid=(grid_steps,),
                in_specs=[tile] * len(ins),
                out_specs=tile,
            ),
            compiler_params=pltpu.CompilerParams(
                dimension_semantics=("parallel",),
                vmem_limit_bytes=_vmem_budget(len(ins) + 1, block_rows),
            ),
            cost_estimate=_cost(n, ins, jnp.dtype(out_dtype).itemsize),
        )(*ins)
        flat = out.reshape(-1)
        if pad:
            flat = flat[:n]
        return flat.reshape(orig_shape)

    if reduction not in ("mean", "sum"):
        raise ValueError(f"unknown reduction {reduction!r}")

    # ----- 'mean' / 'sum': single sequential reduction axis -----
    # TODO(synk): on v7x this axis could be split across both TensorCores with
    # pltpu.CORE_PARALLEL / pl.core_map; kept 1-D for portability (v5e/v6e).
    block_rows = min(MAX_BLOCK_ROWS_RED, rows8)
    grid_steps = _cdiv(rows8, block_rows)
    valid_rows_last = rows8 - (grid_steps - 1) * block_rows   # static, mult of 8
    tile = pl.BlockSpec((block_rows, LANE), lambda i: (i, 0))
    scalar_spec = pl.BlockSpec((1, 1), lambda i: (0, 0))

    x2, t2 = slab(inp), slab(target)

    # sum(weight) is only needed for weighted 'sum'; for weighted 'mean' the
    # module's (reduced * sum(w)) / sum(w) cancels to `reduced`.
    need_w_sum = (weight is not None) and (reduction == "sum")

    if need_w_sum:
        w2 = slab(weight)
        kern = functools.partial(_reduce_loss_w_kernel, block_rows=block_rows,
                                 valid_rows_last=valid_rows_last)
        loss_part, w_part = pl.pallas_call(
            kern,
            out_shape=(jax.ShapeDtypeStruct((1, 1), jnp.float32),
                       jax.ShapeDtypeStruct((1, 1), jnp.float32)),
            grid_spec=pltpu.PrefetchScalarGridSpec(
                num_scalar_prefetch=0,
                grid=(grid_steps,),
                in_specs=[tile, tile, tile],
                out_specs=[scalar_spec, scalar_spec],
                scratch_shapes=[pltpu.VMEM((8, LANE), jnp.float32),
                                pltpu.VMEM((8, LANE), jnp.float32)],
            ),
            compiler_params=pltpu.CompilerParams(
                dimension_semantics=("arbitrary",),
                vmem_limit_bytes=_vmem_budget(3, block_rows),
            ),
            cost_estimate=_cost(n, (x2, t2, w2), 0),
        )(x2, t2, w2)
        loss_sum = loss_part[0, 0]
        w_sum = w_part[0, 0]
    else:
        kern = functools.partial(_reduce_loss_kernel, block_rows=block_rows,
                                 valid_rows_last=valid_rows_last)
        loss_part = pl.pallas_call(
            kern,
            out_shape=jax.ShapeDtypeStruct((1, 1), jnp.float32),
            grid_spec=pltpu.PrefetchScalarGridSpec(
                num_scalar_prefetch=0,
                grid=(grid_steps,),
                in_specs=[tile, tile],
                out_specs=scalar_spec,
                scratch_shapes=[pltpu.VMEM((8, LANE), jnp.float32)],
            ),
            compiler_params=pltpu.CompilerParams(
                dimension_semantics=("arbitrary",),
                vmem_limit_bytes=_vmem_budget(2, block_rows),
            ),
            cost_estimate=_cost(n, (x2, t2), 0),
        )(x2, t2)
        loss_sum = loss_part[0, 0]

    reduced = loss_sum / jnp.float32(n) if reduction == "mean" else loss_sum

    if weight is None:
        return reduced
    if reduction == "mean":
        # module computes (reduced * sum(w)) / sum(w); algebraically == reduced.
        # TODO(synk): original module returns NaN when sum(weight) == 0.
        return reduced
    return reduced * w_sum   # 'sum': sum(reduce(loss) * w) == reduced * sum(w)


# ---------------- reference & test ----------------

def _reference(inp, target, weight, reduction):
    d = inp.astype(jnp.float32) - target.astype(jnp.float32)
    ad = jnp.abs(d)
    loss = jnp.where(ad < 1.0, 0.5 * d * d, ad - 0.5)
    if reduction == "none":
        return loss if weight is None else loss * weight
    red = jnp.mean(loss) if reduction == "mean" else jnp.sum(loss)
    if weight is None:
        return red
    rst = red * weight
    return jnp.sum(rst) / jnp.sum(weight) if reduction == "mean" else jnp.sum(rst)


if __name__ == "__main__":
    root = jax.random.PRNGKey(0)

    def run_checks(seed, shape, cases):
        k1, k2, k3 = jax.random.split(jax.random.fold_in(root, seed), 3)
        x = jax.random.normal(k1, shape, jnp.float32)
        t = jax.random.normal(k2, shape, jnp.float32)
        w = jax.random.uniform(k3, shape, jnp.float32, minval=0.1, maxval=2.0)
        for use_w, red in cases:
            ww = w if use_w else None
            got = jax.block_until_ready(weighted_smooth_l1_loss(x, t, ww, red))
            want = _reference(x, t, ww, red)
            assert jnp.allclose(got, want, rtol=1e-4, atol=1e-4), (shape, use_w, red)

    # Primary small shape (all six combinations), NCHW-like.
    run_checks(0, (2, 4, 16, 16),
               [(True, "mean"), (True, "sum"), (True, "none"),
                (False, "mean"), (False, "sum"), (False, "none")])
    # Ragged size: exercises the minimal 8x128-aligned tail pad.
    run_checks(1, (3, 5, 7),
               [(True, "mean"), (True, "sum"), (True, "none")])
    # Multi-block size with a partial final block: exercises in-kernel masking
    # (reductions) and Pallas boundary-block clipping ('none').
    run_checks(2, (257, 1030),
               [(False, "mean"), (True, "sum"), (True, "none")])

    print("KERNEL_OK")
</pallas_src>

<mosaic_0001>
module attributes {stable_mosaic.version = 11 : i64} {
  func.func @_reduce_loss_kernel(%arg0: i32, %arg1: memref<16x128xf32, #tpu.memory_space<vmem>>, %arg2: memref<16x128xf32, #tpu.memory_space<vmem>>, %arg3: memref<1x1xf32, #tpu.memory_space<vmem>>, %arg4: memref<8x128xf32, #tpu.memory_space<vmem>>) attributes {dimension_semantics = [#tpu.dimension_semantics<arbitrary>], iteration_bounds = array<i64: 1>, scalar_prefetch = 0 : i64, scratch_operands = 1 : i64, tpu.core_type = #tpu.core_type<tc>, window_params = [{transform_indices = @transform_0, window_bounds = array<i64: 16, 128>}, {transform_indices = @transform_1, window_bounds = array<i64: 16, 128>}, {pipeline_mode = #tpu.pipeline_mode<synchronous>, transform_indices = @transform_2, window_bounds = array<i64: 1, 1>}]} {
    %c0_i32 = arith.constant 0 : i32
    %0 = arith.cmpi eq, %arg0, %c0_i32 : i32
    %1 = arith.extui %0 : i1 to i32
    %c0_i32_0 = arith.constant 0 : i32
    %2 = arith.cmpi ne, %1, %c0_i32_0 : i32
    scf.if %2 {
      %cst_13 = arith.constant 0.000000e+00 : f32
      %23 = vector.broadcast %cst_13 : f32 to vector<8x128xf32>
      %c0_14 = arith.constant 0 : index
      %c0_15 = arith.constant 0 : index
      %24 = vector.load %arg4[%c0_14, %c0_15] : memref<8x128xf32, #tpu.memory_space<vmem>>, vector<8x128xf32>
      tpu.vector_store %arg4[%c0_14, %c0_15], %23 {strides = array<i32>} : memref<8x128xf32, #tpu.memory_space<vmem>>, vector<8x128xf32>,
    } else {
    }
    %c0 = arith.constant 0 : index
    %c0_1 = arith.constant 0 : index
    %3 = vector.load %arg1[%c0, %c0_1] : memref<16x128xf32, #tpu.memory_space<vmem>>, vector<16x128xf32>
    %c0_2 = arith.constant 0 : index
    %c0_3 = arith.constant 0 : index
    %4 = vector.load %arg2[%c0_2, %c0_3] : memref<16x128xf32, #tpu.memory_space<vmem>>, vector<16x128xf32>
    %5 = arith.subf %3, %4 : vector<16x128xf32>
    %6 = math.absf %5 : vector<16x128xf32>
    %cst = arith.constant 1.000000e+00 : f32
    %7 = vector.broadcast %cst : f32 to vector<16x128xf32>
    %8 = arith.cmpf olt, %6, %7 : vector<16x128xf32>
    %cst_4 = arith.constant 5.000000e-01 : f32
    %9 = vector.broadcast %cst_4 : f32 to vector<16x128xf32>
    %10 = arith.mulf %9, %5 : vector<16x128xf32>
    %11 = arith.mulf %10, %5 : vector<16x128xf32>
    %cst_5 = arith.constant 5.000000e-01 : f32
    %12 = vector.broadcast %cst_5 : f32 to vector<16x128xf32>
    %13 = arith.subf %6, %12 : vector<16x128xf32>
    %14 = arith.select %8, %11, %13 : vector<16x128xi1>, vector<16x128xf32>
    %c0_6 = arith.constant 0 : index
    %c0_7 = arith.constant 0 : index
    %15 = vector.load %arg4[%c0_6, %c0_7] : memref<8x128xf32, #tpu.memory_space<vmem>>, vector<8x128xf32>
    %16 = vector.shape_cast %14 : vector<16x128xf32> to vector<2x8x128xf32>
    %cst_8 = arith.constant dense<0.000000e+00> : vector<8x128xf32>
    %17 = vector.multi_reduction <add>, %16, %cst_8 [0] : vector<2x8x128xf32> to vector<8x128xf32>
    %18 = arith.addf %15, %17 : vector<8x128xf32>
    %c0_9 = arith.constant 0 : index
    %c0_10 = arith.constant 0 : index
    %19 = vector.load %arg4[%c0_9, %c0_10] : memref<8x128xf32, #tpu.memory_space<vmem>>, vector<8x128xf32>
    tpu.vector_store %arg4[%c0_9, %c0_10], %18 {strides = array<i32>} : memref<8x128xf32, #tpu.memory_space<vmem>>, vector<8x128xf32>,
    %c0_i32_11 = arith.constant 0 : i32
    %20 = arith.cmpi eq, %arg0, %c0_i32_11 : i32
    %21 = arith.extui %20 : i1 to i32
    %c0_i32_12 = arith.constant 0 : i32
    %22 = arith.cmpi ne, %21, %c0_i32_12 : i32
    scf.if %22 {
      %c0_13 = arith.constant 0 : index
      %c0_14 = arith.constant 0 : index
      %23 = vector.load %arg4[%c0_13, %c0_14] : memref<8x128xf32, #tpu.memory_space<vmem>>, vector<8x128xf32>
      %24 = vector.shape_cast %23 : vector<8x128xf32> to vector<1x8x128xf32>
      %cst_15 = arith.constant dense<0.000000e+00> : vector<1xf32>
      %25 = vector.multi_reduction <add>, %24, %cst_15 [1, 2] : vector<1x8x128xf32> to vector<1xf32>
      %26 = vector.shape_cast %25 : vector<1xf32> to vector<1x1x1xf32>
      %27 = vector.extract %26[0, 0, 0] : f32 from vector<1x1x1xf32>
      %28 = vector.broadcast %27 : f32 to vector<1x1xf32>
      %c0_16 = arith.constant 0 : index
      %c0_17 = arith.constant 0 : index
      %29 = vector.load %arg3[%c0_16, %c0_17] : memref<1x1xf32, #tpu.memory_space<vmem>>, vector<1x1xf32>
      tpu.vector_store %arg3[%c0_16, %c0_17], %28 {strides = array<i32>} : memref<1x1xf32, #tpu.memory_space<vmem>>, vector<1x1xf32>,
    } else {
    }
    return
  }
  func.func @transform_0(%arg0: i32) -> (i32, i32) {
    %c0_i32 = arith.constant 0 : i32
    %c0_i32_0 = arith.constant 0 : i32
    return %arg0, %c0_i32 : i32, i32
  }
  func.func @transform_1(%arg0: i32) -> (i32, i32) {
    %c0_i32 = arith.constant 0 : i32
    %c0_i32_0 = arith.constant 0 : i32
    return %arg0, %c0_i32 : i32, i32
  }
  func.func @transform_2(%arg0: i32) -> (i32, i32) {
    %c0_i32 = arith.constant 0 : i32
    %c0_i32_0 = arith.constant 0 : i32
    %c0_i32_1 = arith.constant 0 : i32
    return %c0_i32, %c0_i32_0 : i32, i32
  }
}

</mosaic_0001>

<bundles_post_ra>
// kernel: tpu_custom_call.1
= control target key start
LH: loop header
LB: loop body
LE: loop exit
PB: predicated region body
PF: predicated region fallthrough
CT: control target
= control target key end

     0   :  { %7 = vsyncpa [#allocation4], 0  ;;  %s236_s0 = inlined_call_operand.hbm [shape: f32[16,128], index: 0, kind: input, shape index: {}]   ;;  %s237_s1 = inlined_call_operand.hbm [shape: f32[16,128], index: 1, kind: input, shape index: {}]   ;;  %s238_s2 = inlined_call_operand.hbm [shape: f32[1,1], index: 2, kind: output, shape index: {}]  }
   0x1   :  { %8 = vsyncpa [#allocation7], 0 }
   0x2   :  { %9 = vsyncpa [#allocation5], 0  ;;  %s180_s9 = smov [#allocation3]   ;;  %s108_s13 = scalar_lea.hbm %s236_s0, 256 }
   0x3   :  { %s15_s10 = sshll.u32 %s180_s9, 4  ;;  %p109_p0 = scmp.ne.s32.totalorder %s236_s0, %s108_s13  ;;  %s16_s10 = int_to_ptr.vmem [resolvable:$true] %s15_s10 }
   0x4   :  { %p112_p1 = scmp.lt.u32.totalorder %s108_s13, %s236_s0 }
   0x6   :  { %p114_p2 = pnand %p112_p1, %p109_p0 }
   0x8   :  { %117 = shalt.err (!%p114_p2)
}
   0x9   :  { %s118_s18 = scalar_lea.vmem %s16_s10, 256  ;;  %p123_p4 = scmp.lt.s32.totalorder %s16_s10, %s16_s10 }
   0xa   :  { %p119_p3 = scmp.ne.s32.totalorder %s16_s10, %s118_s18  ;;  %p124_p5 = scmp.lt.s32.totalorder %s118_s18, %s118_s18 }
   0xc   :  { %p125_p6 = por %p124_p5, %p123_p4 }
   0xe   :  { %p126_p7 = pnand %p125_p6, %p119_p3 }
  0x10   :  { %129 = shalt.err (!%p126_p7)
}
  0x11   :  { %s181_s19 = smov 128   ;;  %s182_s20 = smov 8  }
  0x12   :  { %21 = dma.hbm_to_vmem [thread:$0]  %s236_s0, 256, %s16_s10, [#allocation4], %s181_s19, %s181_s19, %s182_s20  }
  0x13   :  { %s183_s23 = smov [#allocation6]   ;;  %s130_s27 = scalar_lea.hbm %s237_s1, 256 }
  0x14   :  { %s27_s24 = sshll.u32 %s183_s23, 4  ;;  %p131_p8 = scmp.ne.s32.totalorder %s237_s1, %s130_s27  ;;  %s28_s24 = int_to_ptr.vmem [resolvable:$true] %s27_s24 }
  0x15   :  { %p134_p9 = scmp.lt.u32.totalorder %s130_s27, %s237_s1 }
  0x17   :  { %p136_p10 = pnand %p134_p9, %p131_p8 }
  0x19   :  { %139 = shalt.err (!%p136_p10)
}
  0x1a   :  { %s140_s4 = scalar_lea.vmem %s28_s24, 256  ;;  %p145_p12 = scmp.lt.s32.totalorder %s28_s24, %s28_s24 }
  0x1b   :  { %p141_p11 = scmp.ne.s32.totalorder %s28_s24, %s140_s4  ;;  %p146_p13 = scmp.lt.s32.totalorder %s140_s4, %s140_s4 }
  0x1d   :  { %p147_p0 = por %p146_p13, %p145_p12 }
  0x1f   :  { %p148_p1 = pnand %p147_p0, %p141_p11 }
  0x21   :  { %151 = shalt.err (!%p148_p1)
}
  0x22   :  { %33 = dma.hbm_to_vmem [thread:$0]  %s237_s1, 256, %s28_s24, [#allocation7], %s181_s19, %s181_s19, %s182_s20  }
  0x23   :  { %174 = dma.done.wait [#allocation4], 256  }
  0x24   :  { %175 = vsyncadd [#allocation4], 4294967040 }
  0x25   :  { %176 = dma.done.wait [#allocation7], 256  }
  0x26   :  { %177 = vsyncadd [#allocation7], 4294967040  ;;  %v45_v0 = vld [vmem:[#allocation3] sm:$0xff]  ;;  %v46_v1 = vld [vmem:[#allocation3 + $0x8] sm:$0xff]  ;;  %s184_s1 = smov [#allocation8]   ;;  %vm81_vm2 = vcmask 0  }
  0x27   :  { %v47_v2 = vld [vmem:[#allocation6] sm:$0xff]  ;;  %v48_v3 = vld [vmem:[#allocation6 + $0x8] sm:$0xff]  ;;  %s89_s6 = sshll.u32 %s184_s1, 4  ;;  %s90_s6 = int_to_ptr.vmem [resolvable:$true] %s89_s6 }
  0x28   :  { %v49_v4 = vsub.f32 %v45_v0, %v47_v2  ;;  %v50_v5 = vsub.f32 %v46_v1, %v48_v3  ;;  %s152_s8 = scalar_lea.vmem %s90_s6, 16  ;;  %s156_s9 = scalar_lea.vmem %s90_s6, 32 }
  0x29   :  { %p153_p2 = scmp.ne.s32.totalorder %s90_s6, %s152_s8  ;;  %p157_p3 = scmp.lt.s32.totalorder %s90_s6, %s90_s6 }
  0x2a   :  { %v51_v6 = vand.u32 2147483647, %v49_v4  ;;  %v55_v7 = vmul.f32 0.5, %v49_v4  ;;  %v52_v8 = vand.u32 2147483647, %v50_v5  ;;  %v56_v9 = vmul.f32 0.5, %v50_v5  ;;  %p158_p4 = scmp.lt.s32.totalorder %s156_s9, %s152_s8 }
  0x2c   :  { %vm53_vm0 = vcmp.lt.f32.partialorder %v51_v6, 1.0  ;;  %v57_v10 = vmul.f32 %v55_v7, %v49_v4  ;;  %v99_v11 = vadd.f32 -0.5, %v51_v6  ;;  %vm54_vm1 = vcmp.lt.f32.partialorder %v52_v8, 1.0  ;;  %p159_p5 = por %p158_p4, %p157_p3 }
  0x2d   :  { %v58_v12 = vmul.f32 %v56_v9, %v50_v5  ;;  %v100_v13 = vadd.f32 -0.5, %v52_v8 }
  0x2e   :  { %v61_v14 = vsel %vm53_vm0, %v57_v10, %v99_v11  ;;  %p160_p6 = pnand %p159_p5, %p153_p2 }
  0x2f   :  { %v62_v15 = vsel %vm54_vm1, %v58_v12, %v100_v13 }
  0x30   :  { %v64_v16 = vadd.f32 %v62_v15, %v61_v14 }
  0x32   :  { %71 = vadd.xlane.f32.xlu0 %v64_v16 }
  0xbf   :  { %v72_v17 = vpop.xlane.xlu0 %71 }
  0xc0   :  { %v73_v18 = vrot.slane %v72_v17, 4 }
  0xc2   :  { %v74_v19 = vadd.f32 %v73_v18, %v72_v17 }
  0xc4   :  { %v75_v20 = vrot.slane %v74_v19, 2 }
  0xc6   :  { %v76_v21 = vadd.f32 %v75_v20, %v74_v19 }
  0xc8   :  { %v77_v22 = vrot.slane %v76_v21, 1 }
  0xca   :  { %v78_v23 = vadd.f32 %v77_v22, %v76_v21 }
  0xcc   :  { %101 = vpush %v78_v23 }
  0xfd   :  { %s102_s7 = spop %101 }
  0xfe   :  { %v80_v24 = vstv %s102_s7 }
  0xff   :  { %82 = vst.msk [vmem:[#allocation8] sm:$0x1] %vm81_vm2, %v80_v24 }
 0x100   :  { %163 = shalt.err (!%p160_p6)
}
 0x101   :  { %s164_s12 = scalar_lea.hbm %s238_s2, 16 }
 0x102   :  { %p165_p7 = scmp.ne.s32.totalorder %s238_s2, %s164_s12  ;;  %p168_p8 = scmp.lt.u32.totalorder %s164_s12, %s238_s2 }
 0x104   :  { %p170_p9 = pnand %p168_p8, %p165_p7 }
 0x106   :  { %173 = shalt.err (!%p170_p9)
}
 0x107   :  { %92 = dma.vmem_to_hbm [thread:$0]  %s90_s6, 16, %s238_s2, [#allocation5]  }
 0x108   :  { %178 = dma.done.wait [#allocation5], 16  }
 0x109   :  { %179 = vsyncadd [#allocation5], 4294967280 }
 0x10a   :  { %96 = vsyncpa [#allocation4], 1 }
 0x10b   :  { %97 = vsyncpa [#allocation7], 1 }
 0x10c   :  { %98 = vsyncpa [#allocation5], 1 }

</bundles_post_ra>
